<compile_context>
chip_gen: v7x
topology: tpu7x:2x2x1
jax: 0.10.0
libtpu: 0.0.40
codegen_flags: <defaults>
</compile_context>

<pallas_src>
import functools

import jax
import jax.numpy as jnp
from jax.experimental import pallas as pl
from jax.experimental.pallas import tpu as pltpu

# ------------------------- config (parsers() hard-coded, small shapes) -------------------------
BATCH = 2
ENCODE_LAYER = 12          # parsers().encode_layer  (height of the input "image")
HIDDEN = 32                # parsers().hidden_size   (width of the input, on the lane axis)
NUM_FILTERS = 4            # parsers().num_filters
FILTER_SIZES = (2, 3, 4)   # parsers().filter_sizes
CLASS_NUM = 3              # parsers().class_num
NUM_FILTER_TOTAL = NUM_FILTERS * len(FILTER_SIZES)


@functools.lru_cache(maxsize=None)
def _textcnn_call(B, L, H, F, sizes, C):
    """One fused pallas_call for the whole TextCNN forward."""
    n = len(sizes)

    def kernel(*refs):
        x_ref = refs[0]                      # (1, L, H) block: one batch row
        conv_refs = refs[1:1 + 2 * n]        # (w, b) pair per filter size
        wout_ref = refs[1 + 2 * n]           # (n*F, C)
        bout_ref = refs[2 + 2 * n]           # (1, C)
        o_ref = refs[3 + 2 * n]              # (1, 1, C)

        xb = x_ref[0]                                            # [L, H]
        pooled = []
        for i, s in enumerate(sizes):
            w = conv_refs[2 * i][...]                            # [s*H, F] (tap-major)
            bias = conv_refs[2 * i + 1][...]                     # [1, F]
            Lo = L - s + 1
            # im2col over height: one K = s*H MXU contraction per branch.
            win = jnp.concatenate(
                [xb[ds:ds + Lo, :] for ds in range(s)], axis=-1)  # [Lo, s*H]
            y = jnp.dot(win, w, preferred_element_type=jnp.float32) + bias
            y = jnp.maximum(y, 0.0)                              # fused bias + ReLU (VPU)
            pooled.append(jnp.max(y, axis=0, keepdims=True))     # global max-pool -> [1, F]
        # torch.cat(pooled_outputs, dim=3).reshape(-1, n*F): filter-size-major order.
        h_pool = jnp.concatenate(pooled, axis=-1)                # [1, n*F]
        logits = jnp.dot(h_pool, wout_ref[...],
                         preferred_element_type=jnp.float32) + bout_ref[...]
        o_ref[0] = logits                                        # [1, C]

    in_specs = [pl.BlockSpec((1, L, H), lambda b: (b, 0, 0))]
    for s in sizes:
        in_specs.append(pl.BlockSpec((s * H, F), lambda b: (0, 0)))
        in_specs.append(pl.BlockSpec((1, F), lambda b: (0, 0)))
    in_specs.append(pl.BlockSpec((n * F, C), lambda b: (0, 0)))
    in_specs.append(pl.BlockSpec((1, C), lambda b: (0, 0)))

    return pl.pallas_call(
        kernel,
        out_shape=jax.ShapeDtypeStruct((B, 1, C), jnp.float32),
        grid=(B,),
        in_specs=in_specs,
        out_specs=pl.BlockSpec((1, 1, C), lambda b: (b, 0, 0)),
        compiler_params=pltpu.CompilerParams(
            dimension_semantics=("parallel",)),
    )


def textcnn_forward(params, x):
    """x: [B, encode_layer, hidden]  (what the torch forward receives and unsqueeze(1)s)."""
    B, L, H = x.shape
    call = _textcnn_call(B, L, H, NUM_FILTERS, FILTER_SIZES, CLASS_NUM)
    args = [x]
    for s in FILTER_SIZES:
        args.append(params[f"w_conv{s}"])
        args.append(params[f"b_conv{s}"].reshape(1, NUM_FILTERS))
    args.append(params["w_out"])
    args.append(params["b_out"].reshape(1, CLASS_NUM))
    return call(*args).reshape(B, CLASS_NUM)


# ------------------------- pure-JAX reference (correctness check) -------------------------
def textcnn_reference(params, x):
    pooled = []
    for s in FILTER_SIZES:
        w = params[f"w_conv{s}"]
        b = params[f"b_conv{s}"]
        Lo = ENCODE_LAYER - s + 1
        win = jnp.concatenate([x[:, ds:ds + Lo, :] for ds in range(s)], axis=-1)
        y = jnp.einsum("blk,kf->blf", win, w, precision="highest") + b
        y = jnp.maximum(y, 0.0)
        pooled.append(jnp.max(y, axis=1))
    h = jnp.concatenate(pooled, axis=-1)
    return jnp.dot(h, params["w_out"], precision="highest") + params["b_out"]


# ------------------------- deterministic parameter init -------------------------
def init_params(key):
    # TODO(synk): real weights come from a trained checkpoint; synthesized deterministically here.
    ks = iter(jax.random.split(key, 2 * len(FILTER_SIZES) + 2))

    def nrm(shape, scale=0.05):
        return (scale * jax.random.normal(next(ks), shape)).astype(jnp.float32)

    p = {}
    for s in FILTER_SIZES:
        # PyTorch Conv2d weight [F, 1, s, H] stored pre-flattened as [s*H, F]
        # (tap-major, hidden-minor) so each branch is a single im2col matmul.
        p[f"w_conv{s}"] = nrm((s, HIDDEN, NUM_FILTERS)).reshape(s * HIDDEN, NUM_FILTERS)
        p[f"b_conv{s}"] = nrm((NUM_FILTERS,))
    p["w_out"] = nrm((NUM_FILTER_TOTAL, CLASS_NUM))       # nn.Linear(..., bias=False).weight.T
    p["b_out"] = jnp.ones((CLASS_NUM,), jnp.float32)      # nn.Parameter(torch.ones([class_num]))
    return p


if __name__ == "__main__":
    key = jax.random.PRNGKey(0)
    kp, kx = jax.random.split(key)
    params = init_params(kp)
    x = jax.random.normal(kx, (BATCH, ENCODE_LAYER, HIDDEN), dtype=jnp.float32)

    out = textcnn_forward(params, x)
    out = jax.block_until_ready(out)
    assert out.shape == (BATCH, CLASS_NUM), out.shape

    ref = textcnn_reference(params, x)
    assert jnp.allclose(out, ref, atol=1e-3, rtol=1e-3), (out, ref)

    print("KERNEL_OK")
</pallas_src>

<mosaic_0001>
module attributes {stable_mosaic.version = 11 : i64} {
  func.func @kernel(%arg0: i32, %arg1: memref<1x12x32xf32, #tpu.memory_space<vmem>>, %arg2: memref<64x4xf32, #tpu.memory_space<vmem>>, %arg3: memref<1x4xf32, #tpu.memory_space<vmem>>, %arg4: memref<96x4xf32, #tpu.memory_space<vmem>>, %arg5: memref<1x4xf32, #tpu.memory_space<vmem>>, %arg6: memref<128x4xf32, #tpu.memory_space<vmem>>, %arg7: memref<1x4xf32, #tpu.memory_space<vmem>>, %arg8: memref<12x3xf32, #tpu.memory_space<vmem>>, %arg9: memref<1x3xf32, #tpu.memory_space<vmem>>, %arg10: memref<1x1x3xf32, #tpu.memory_space<vmem>>) attributes {dimension_semantics = [#tpu.dimension_semantics<parallel>], iteration_bounds = array<i64: 2>, scalar_prefetch = 0 : i64, scratch_operands = 0 : i64, tpu.core_type = #tpu.core_type<tc>, window_params = [{transform_indices = @transform_0, window_bounds = array<i64: 1, 12, 32>}, {pipeline_mode = #tpu.pipeline_mode<synchronous>, transform_indices = @transform_1, window_bounds = array<i64: 64, 4>}, {pipeline_mode = #tpu.pipeline_mode<synchronous>, transform_indices = @transform_2, window_bounds = array<i64: 1, 4>}, {pipeline_mode = #tpu.pipeline_mode<synchronous>, transform_indices = @transform_3, window_bounds = array<i64: 96, 4>}, {pipeline_mode = #tpu.pipeline_mode<synchronous>, transform_indices = @transform_4, window_bounds = array<i64: 1, 4>}, {pipeline_mode = #tpu.pipeline_mode<synchronous>, transform_indices = @transform_5, window_bounds = array<i64: 128, 4>}, {pipeline_mode = #tpu.pipeline_mode<synchronous>, transform_indices = @transform_6, window_bounds = array<i64: 1, 4>}, {pipeline_mode = #tpu.pipeline_mode<synchronous>, transform_indices = @transform_7, window_bounds = array<i64: 12, 3>}, {pipeline_mode = #tpu.pipeline_mode<synchronous>, transform_indices = @transform_8, window_bounds = array<i64: 1, 3>}, {transform_indices = @transform_9, window_bounds = array<i64: 1, 1, 3>}]} {
    %c0 = arith.constant 0 : index
    %c0_0 = arith.constant 0 : index
    %c0_1 = arith.constant 0 : index
    %0 = vector.load %arg1[%c0, %c0_0, %c0_1] : memref<1x12x32xf32, #tpu.memory_space<vmem>>, vector<1x12x32xf32>
    %1 = vector.shape_cast %0 : vector<1x12x32xf32> to vector<12x32xf32>
    %c0_2 = arith.constant 0 : index
    %c0_3 = arith.constant 0 : index
    %2 = vector.load %arg2[%c0_2, %c0_3] : memref<64x4xf32, #tpu.memory_space<vmem>>, vector<64x4xf32>
    %c0_4 = arith.constant 0 : index
    %c0_5 = arith.constant 0 : index
    %3 = vector.load %arg3[%c0_4, %c0_5] : memref<1x4xf32, #tpu.memory_space<vmem>>, vector<1x4xf32>
    %4 = vector.extract_strided_slice %1 {offsets = [0, 0], sizes = [11, 32], strides = [1, 1]} : vector<12x32xf32> to vector<11x32xf32>
    %5 = vector.extract_strided_slice %1 {offsets = [1, 0], sizes = [11, 32], strides = [1, 1]} : vector<12x32xf32> to vector<11x32xf32>
    %6 = tpu.concatenate %4, %5 in 1 : vector<11x32xf32>, vector<11x32xf32> -> vector<11x64xf32>
    %cst = arith.constant dense<0.000000e+00> : vector<11x4xf32>
    %7 = tpu.matmul %6, %2, %cst {dimension_numbers = #tpu.dot_dimension_numbers<[1], [0], [0], [1], [0, 0, 1, 1], [], []>} : vector<11x64xf32>, vector<64x4xf32>, vector<11x4xf32> -> vector<11x4xf32>
    %8 = vector.broadcast %3 : vector<1x4xf32> to vector<11x4xf32>
    %9 = arith.addf %7, %8 : vector<11x4xf32>
    %cst_6 = arith.constant 0.000000e+00 : f32
    %10 = vector.broadcast %cst_6 : f32 to vector<11x4xf32>
    %11 = arith.maximumf %9, %10 : vector<11x4xf32>
    %cst_7 = arith.constant dense<0xFF800000> : vector<4xf32>
    %12 = vector.multi_reduction <maximumf>, %11, %cst_7 [0] : vector<11x4xf32> to vector<4xf32>
    %13 = vector.shape_cast %12 : vector<4xf32> to vector<1x4xf32>
    %c0_8 = arith.constant 0 : index
    %c0_9 = arith.constant 0 : index
    %14 = vector.load %arg4[%c0_8, %c0_9] : memref<96x4xf32, #tpu.memory_space<vmem>>, vector<96x4xf32>
    %c0_10 = arith.constant 0 : index
    %c0_11 = arith.constant 0 : index
    %15 = vector.load %arg5[%c0_10, %c0_11] : memref<1x4xf32, #tpu.memory_space<vmem>>, vector<1x4xf32>
    %16 = vector.extract_strided_slice %1 {offsets = [0, 0], sizes = [10, 32], strides = [1, 1]} : vector<12x32xf32> to vector<10x32xf32>
    %17 = vector.extract_strided_slice %1 {offsets = [1, 0], sizes = [10, 32], strides = [1, 1]} : vector<12x32xf32> to vector<10x32xf32>
    %18 = vector.extract_strided_slice %1 {offsets = [2, 0], sizes = [10, 32], strides = [1, 1]} : vector<12x32xf32> to vector<10x32xf32>
    %19 = tpu.concatenate %16, %17, %18 in 1 : vector<10x32xf32>, vector<10x32xf32>, vector<10x32xf32> -> vector<10x96xf32>
    %cst_12 = arith.constant dense<0.000000e+00> : vector<10x4xf32>
    %20 = tpu.matmul %19, %14, %cst_12 {dimension_numbers = #tpu.dot_dimension_numbers<[1], [0], [0], [1], [0, 0, 1, 1], [], []>} : vector<10x96xf32>, vector<96x4xf32>, vector<10x4xf32> -> vector<10x4xf32>
    %21 = vector.broadcast %15 : vector<1x4xf32> to vector<10x4xf32>
    %22 = arith.addf %20, %21 : vector<10x4xf32>
    %cst_13 = arith.constant 0.000000e+00 : f32
    %23 = vector.broadcast %cst_13 : f32 to vector<10x4xf32>
    %24 = arith.maximumf %22, %23 : vector<10x4xf32>
    %cst_14 = arith.constant dense<0xFF800000> : vector<4xf32>
    %25 = vector.multi_reduction <maximumf>, %24, %cst_14 [0] : vector<10x4xf32> to vector<4xf32>
    %26 = vector.shape_cast %25 : vector<4xf32> to vector<1x4xf32>
    %c0_15 = arith.constant 0 : index
    %c0_16 = arith.constant 0 : index
    %27 = vector.load %arg6[%c0_15, %c0_16] : memref<128x4xf32, #tpu.memory_space<vmem>>, vector<128x4xf32>
    %c0_17 = arith.constant 0 : index
    %c0_18 = arith.constant 0 : index
    %28 = vector.load %arg7[%c0_17, %c0_18] : memref<1x4xf32, #tpu.memory_space<vmem>>, vector<1x4xf32>
    %29 = vector.extract_strided_slice %1 {offsets = [0, 0], sizes = [9, 32], strides = [1, 1]} : vector<12x32xf32> to vector<9x32xf32>
    %30 = vector.extract_strided_slice %1 {offsets = [1, 0], sizes = [9, 32], strides = [1, 1]} : vector<12x32xf32> to vector<9x32xf32>
    %31 = vector.extract_strided_slice %1 {offsets = [2, 0], sizes = [9, 32], strides = [1, 1]} : vector<12x32xf32> to vector<9x32xf32>
    %32 = vector.extract_strided_slice %1 {offsets = [3, 0], sizes = [9, 32], strides = [1, 1]} : vector<12x32xf32> to vector<9x32xf32>
    %33 = tpu.concatenate %29, %30, %31, %32 in 1 : vector<9x32xf32>, vector<9x32xf32>, vector<9x32xf32>, vector<9x32xf32> -> vector<9x128xf32>
    %cst_19 = arith.constant dense<0.000000e+00> : vector<9x4xf32>
    %34 = tpu.matmul %33, %27, %cst_19 {dimension_numbers = #tpu.dot_dimension_numbers<[1], [0], [0], [1], [0, 0, 1, 1], [], []>} : vector<9x128xf32>, vector<128x4xf32>, vector<9x4xf32> -> vector<9x4xf32>
    %35 = vector.broadcast %28 : vector<1x4xf32> to vector<9x4xf32>
    %36 = arith.addf %34, %35 : vector<9x4xf32>
    %cst_20 = arith.constant 0.000000e+00 : f32
    %37 = vector.broadcast %cst_20 : f32 to vector<9x4xf32>
    %38 = arith.maximumf %36, %37 : vector<9x4xf32>
    %cst_21 = arith.constant dense<0xFF800000> : vector<4xf32>
    %39 = vector.multi_reduction <maximumf>, %38, %cst_21 [0] : vector<9x4xf32> to vector<4xf32>
    %40 = vector.shape_cast %39 : vector<4xf32> to vector<1x4xf32>
    %41 = tpu.concatenate %13, %26, %40 in 1 : vector<1x4xf32>, vector<1x4xf32>, vector<1x4xf32> -> vector<1x12xf32>
    %c0_22 = arith.constant 0 : index
    %c0_23 = arith.constant 0 : index
    %42 = vector.load %arg8[%c0_22, %c0_23] : memref<12x3xf32, #tpu.memory_space<vmem>>, vector<12x3xf32>
    %cst_24 = arith.constant dense<0.000000e+00> : vector<1x3xf32>
    %43 = tpu.matmul %41, %42, %cst_24 {dimension_numbers = #tpu.dot_dimension_numbers<[1], [0], [0], [1], [0, 0, 1, 1], [], []>} : vector<1x12xf32>, vector<12x3xf32>, vector<1x3xf32> -> vector<1x3xf32>
    %c0_25 = arith.constant 0 : index
    %c0_26 = arith.constant 0 : index
    %44 = vector.load %arg9[%c0_25, %c0_26] : memref<1x3xf32, #tpu.memory_space<vmem>>, vector<1x3xf32>
    %45 = arith.addf %43, %44 : vector<1x3xf32>
    %c0_27 = arith.constant 0 : index
    %c0_28 = arith.constant 0 : index
    %c0_29 = arith.constant 0 : index
    %46 = vector.load %arg10[%c0_27, %c0_28, %c0_29] : memref<1x1x3xf32, #tpu.memory_space<vmem>>, vector<1x1x3xf32>
    %47 = vector.shape_cast %46 : vector<1x1x3xf32> to vector<1x3xf32>
    %48 = vector.shape_cast %45 : vector<1x3xf32> to vector<1x1x3xf32>
    tpu.vector_store %arg10[%c0_27, %c0_28, %c0_29], %48 {strides = array<i32>} : memref<1x1x3xf32, #tpu.memory_space<vmem>>, vector<1x1x3xf32>,
    return
  }
  func.func @transform_0(%arg0: i32) -> (i32, i32, i32) {
    %c0_i32 = arith.constant 0 : i32
    %c0_i32_0 = arith.constant 0 : i32
    %c0_i32_1 = arith.constant 0 : i32
    return %arg0, %c0_i32, %c0_i32_0 : i32, i32, i32
  }
  func.func @transform_1(%arg0: i32) -> (i32, i32) {
    %c0_i32 = arith.constant 0 : i32
    %c0_i32_0 = arith.constant 0 : i32
    %c0_i32_1 = arith.constant 0 : i32
    return %c0_i32, %c0_i32_0 : i32, i32
  }
  func.func @transform_2(%arg0: i32) -> (i32, i32) {
    %c0_i32 = arith.constant 0 : i32
    %c0_i32_0 = arith.constant 0 : i32
    %c0_i32_1 = arith.constant 0 : i32
    return %c0_i32, %c0_i32_0 : i32, i32
  }
  func.func @transform_3(%arg0: i32) -> (i32, i32) {
    %c0_i32 = arith.constant 0 : i32
    %c0_i32_0 = arith.constant 0 : i32
    %c0_i32_1 = arith.constant 0 : i32
    return %c0_i32, %c0_i32_0 : i32, i32
  }
  func.func @transform_4(%arg0: i32) -> (i32, i32) {
    %c0_i32 = arith.constant 0 : i32
    %c0_i32_0 = arith.constant 0 : i32
    %c0_i32_1 = arith.constant 0 : i32
    return %c0_i32, %c0_i32_0 : i32, i32
  }
  func.func @transform_5(%arg0: i32) -> (i32, i32) {
    %c0_i32 = arith.constant 0 : i32
    %c0_i32_0 = arith.constant 0 : i32
    %c0_i32_1 = arith.constant 0 : i32
    return %c0_i32, %c0_i32_0 : i32, i32
  }
  func.func @transform_6(%arg0: i32) -> (i32, i32) {
    %c0_i32 = arith.constant 0 : i32
    %c0_i32_0 = arith.constant 0 : i32
    %c0_i32_1 = arith.constant 0 : i32
    return %c0_i32, %c0_i32_0 : i32, i32
  }
  func.func @transform_7(%arg0: i32) -> (i32, i32) {
    %c0_i32 = arith.constant 0 : i32
    %c0_i32_0 = arith.constant 0 : i32
    %c0_i32_1 = arith.constant 0 : i32
    return %c0_i32, %c0_i32_0 : i32, i32
  }
  func.func @transform_8(%arg0: i32) -> (i32, i32) {
    %c0_i32 = arith.constant 0 : i32
    %c0_i32_0 = arith.constant 0 : i32
    %c0_i32_1 = arith.constant 0 : i32
    return %c0_i32, %c0_i32_0 : i32, i32
  }
  func.func @transform_9(%arg0: i32) -> (i32, i32, i32) {
    %c0_i32 = arith.constant 0 : i32
    %c0_i32_0 = arith.constant 0 : i32
    %c0_i32_1 = arith.constant 0 : i32
    return %arg0, %c0_i32, %c0_i32_0 : i32, i32, i32
  }
}

</mosaic_0001>

<bundles_post_ra>
// kernel: tpu_custom_call.1
= control target key start
LH: loop header
LB: loop body
LE: loop exit
PB: predicated region body
PF: predicated region fallthrough
CT: control target
= control target key end

     0   :  { %14 = vsyncpa [#allocation3], 0  ;;  %s1523_s0 = inlined_call_operand.vmem [shape: f32[2,12,32], index: 0, kind: input, shape index: {}]   ;;  %s1524_s1 = inlined_call_operand.vmem [shape: f32[64,4], index: 1, kind: input, shape index: {}]   ;;  %s1525_s2 = inlined_call_operand.vmem [shape: f32[1,4], index: 2, kind: input, shape index: {}]   ;;  %s1526_s3 = inlined_call_operand.vmem [shape: f32[96,4], index: 3, kind: input, shape index: {}]   ;;  %s1527_s4 = inlined_call_operand.vmem [shape: f32[1,4], index: 4, kind: input, shape index: {}]   ;;  %s1528_s5 = inlined_call_operand.vmem [shape: f32[128,4], index: 5, kind: input, shape index: {}]   ;;  %s1529_s6 = inlined_call_operand.vmem [shape: f32[1,4], index: 6, kind: input, shape index: {}]   ;;  %s1530_s7 = inlined_call_operand.vmem [shape: f32[12,3], index: 7, kind: input, shape index: {}]   ;;  %s1531_s8 = inlined_call_operand.vmem [shape: f32[1,3], index: 8, kind: input, shape index: {}]   ;;  %s1532_s9 = inlined_call_operand.hbm [shape: f32[2,1,3], index: 9, kind: output, shape index: {}]  }
   0x1   :  { %16 = vsyncpa [#allocation3 + $0x1], 0  ;;  %s1271_s30 = smov 0   ;;  %s1273_s10 = smov 0  }
   0x2   :  { %s1275_s11 = smov 0   ;;  %s1277_s12 = smov 0  }
   0x3 LB: > { %s1292_s13 = sadd.s32 4294967295, %s1209_s12   ;;  %s866_s14 = sadd.s32 4294967294, %s1209_s12   ;;  %s1209_s12 = sphi %s1277_s12, %s1538_s12   ;;  %s1205_s11 = sphi %s1275_s11, %s1537_s11   ;;  %s1201_s10 = sphi %s1273_s10, %s1536_s10   ;;  %s1197_s30 = sphi %s1271_s30, %s1535_s30  }
   0x4   : > { %s1296_s15 = sadd.s32 1, %s1209_s12   ;;  %s223_s16 = sadd.s32 1, %s1205_s11 }
   0x5   : > { %s220_s17 = ssub.s32 %s1209_s12, %s1296_s15  ;;  %p233_p0 = scmp.ne.s32.totalorder %s1205_s11, %s1201_s10 }
   0x6   : > { %p221_p1 = scmp.eq.s32.totalorder %s220_s17, 0  ;;  %p234_p2 = scmp.eq.s32.totalorder %s1292_s13, 1 }
   0x7   : > { %p239_p3 = scmp.ne.s32.totalorder %s1201_s10, %s1197_s30  ;;  %p240_p4 = scmp.eq.s32.totalorder %s866_s14, 1 }
   0x8   : > { %s1307_s18 = scalar_select %p221_p1, %s1205_s11, %s223_s16  }
   0x9   : > { %p1309_p5 = por %p234_p2, %p233_p0  ;;  %p1313_p6 = por %p240_p4, %p239_p3 }
   0xa   : > { %p869_p7 = scmp.ge.s32.totalorder %s1209_s12, 1  ;;  %p290_p8 = scmp.lt.s32.totalorder %s1209_s12, 3 }
   0xc   : > { %p291_p9 = pnand %p869_p7, %p290_p8 }
   0xd   : > { %p325_p10 = scmp.lt.s32.totalorder (!%p291_p9), %s1292_s13, 1  ;;  %v582_v0 = vld [vmem:[%s1528_s5] sm:$0xff] (!%p291_p9)  ;;  %v583_v1 = vld [vmem:[%s1528_s5 + $0x8] sm:$0xff] (!%p291_p9)  ;;  %v584_v2 = vld [vmem:[%s1528_s5 + $0x10] sm:$0xff] (!%p291_p9)  ;;  %vm343_vm0 = vcmask (!%p291_p9), 1046528   ;;  %vm470_vm1 = vcmask (!%p291_p9), 1045504  }
   0xe   : > { %294 = sbr.rel (%p291_p9) target bundleno = 750 (0x2ee), region = 56  ;;  %v585_v3 = vld [vmem:[%s1528_s5 + $0x18] sm:$0xff] (!%p291_p9)  ;;  %v1058_v4 = vpack.c.bf16 (!%p291_p9), %v583_v1, %v582_v0  ;;  %v332_v6 = vld [vmem:[%s1524_s1] sm:$0xff] (!%p291_p9)  ;;  %v333_v7 = vld [vmem:[%s1524_s1 + $0x8] sm:$0xff] (!%p291_p9)  ;;  %vm599_vm2 = vcmask (!%p291_p9), 1044480   ;;  %s1211_s23 = smov (!%p291_p9), 32  }
   0xf   : > { %v1062_v5 = vpack.c.bf16 (!%p291_p9), %v585_v3, %v584_v2  ;;  %v586_v8 = vld [vmem:[%s1528_s5 + $0x20] sm:$0xff] (!%p291_p9)  ;;  %v1018_v9 = vpack.c.bf16 (!%p291_p9), %v333_v7, %v332_v6  ;;  %v587_v10 = vld [vmem:[%s1528_s5 + $0x28] sm:$0xff] (!%p291_p9)  ;;  %v334_v11 = vld [vmem:[%s1524_s1 + $0x10] sm:$0xff] (!%p291_p9)  ;;  %s1212_s24 = smov (!%p291_p9), 64   ;;  %vm353_vm3 = vcmask (!%p291_p9), 261120   ;;  %vm362_vm4 = vcmask (!%p291_p9), 523264  }
  0x10   : > { %v335_v12 = vld [vmem:[%s1524_s1 + $0x18] sm:$0xff] (!%p291_p9)  ;;  %1059 = vmatprep.subr.bf16.mxu0 (!%p291_p9), %v1058_v4  ;;  %v336_v14 = vld [vmem:[%s1524_s1 + $0x20] sm:$0xff] (!%p291_p9)  ;;  %v337_v15 = vld [vmem:[%s1524_s1 + $0x28] sm:$0xff] (!%p291_p9)  ;;  %v1066_v18 = vpack.c.bf16 (!%p291_p9), %v587_v10, %v586_v8  ;;  %vm488_vm5 = vcmask (!%p291_p9), 785408   ;;  %vm448_vm6 = vcmask (!%p291_p9), 26624   ;;  %vm446_vm7 = vcmask (!%p291_p9), 31744  }
  0x11   : > { %v1022_v13 = vpack.c.bf16 (!%p291_p9), %v335_v12, %v334_v11  ;;  %1061 = vmatpush3.bf16.msra.mxu0 (!%p291_p9), %v1058_v4  ;;  %1019 = vmatprep.subr.bf16.mxu1 (!%p291_p9), %v1018_v9  ;;  %v588_v25 = vld [vmem:[%s1528_s5 + $0x30] sm:$0xff] (!%p291_p9)  ;;  %v589_v26 = vld [vmem:[%s1528_s5 + $0x38] sm:$0xff] (!%p291_p9)  ;;  %v1026_v27 = vpack.c.bf16 (!%p291_p9), %v337_v15, %v336_v14  ;;  %v590_v34 = vld [vmem:[%s1528_s5 + $0x40] sm:$0xff] (!%p291_p9)  ;;  %vm695_vm8 = vcmask (!%p291_p9), 24576   ;;  %vm722_vm9 = vcmask (!%p291_p9), 1043456   ;;  %s1216_s27 = smov (!%p291_p9), 8  }
  0x12   : > { %1063 = vmatprep.subr.bf16.mxu0 (!%p291_p9), %v1062_v5  ;;  %1021 = vmatpush3.bf16.msra.mxu1 (!%p291_p9), %v1018_v9  ;;  %v338_v30 = vld [vmem:[%s1524_s1 + $0x30] sm:$0xff] (!%p291_p9)  ;;  %v339_v31 = vld [vmem:[%s1524_s1 + $0x38] sm:$0xff] (!%p291_p9)  ;;  %v1070_v33 = vpack.c.bf16 (!%p291_p9), %v589_v26, %v588_v25  ;;  %v591_v35 = vld [vmem:[%s1528_s5 + $0x48] sm:$0xff] (!%p291_p9)  ;;  %vm1215_vm10 = vmmov (!%p291_p9), 1   ;;  %vm573_vm12 = vcmask (!%p291_p9), 25600   ;;  %vm1217_vm13 = vmmov (!%p291_p9), 0  }
  0x13   : > { %1023 = vmatprep.subr.bf16.mxu1 (!%p291_p9), %v1022_v13  ;;  %v1030_v36 = vpack.c.bf16 (!%p291_p9), %v339_v31, %v338_v30  ;;  %v457_v37 = vld [vmem:[%s1526_s3] sm:$0xff] (!%p291_p9)  ;;  %v458_v38 = vld [vmem:[%s1526_s3 + $0x8] sm:$0xff] (!%p291_p9)  ;;  %v1074_v40 = vpack.c.bf16 (!%p291_p9), %v591_v35, %v590_v34  ;;  %v592_v41 = vld [vmem:[%s1528_s5 + $0x50] sm:$0xff] (!%p291_p9)  ;;  %s1219_s28 = smov (!%p291_p9), 4   ;;  %vm713_vm14 = vcmask (!%p291_p9), 64512   ;;  %vm718_vm15 = vcmask (!%p291_p9), 97280  }
  0x14   : > { %v593_v42 = vld [vmem:[%s1528_s5 + $0x58] sm:$0xff] (!%p291_p9)  ;;  %v1034_v43 = vpack.c.bf16 (!%p291_p9), %v458_v38, %v457_v37  ;;  %v594_v45 = vld [vmem:[%s1528_s5 + $0x60] sm:$0xff] (!%p291_p9)  ;;  %v595_v46 = vld [vmem:[%s1528_s5 + $0x68] sm:$0xff] (!%p291_p9)  ;;  %v1214_v37 = vmov (!%p291_p9), 0.0|0.0   ;;  %s323_s14 = sand.u32 (!%p291_p9), 1, %s1201_s10   ;;  %s881_s21 = sshll.u32 (!%p291_p9), %s1292_s13, 4 }
  0x15   : > { %s326_s29 = scalar_select %p325_p10, %s1292_s13, 1  ;;  %1065 = vmatpush3.bf16.msra.mxu0 %v1062_v5  ;;  %v1078_v44 = vpack.c.bf16 %v593_v42, %v592_v41  ;;  %v1082_v47 = vpack.c.bf16 %v595_v46, %v594_v45  ;;  %v596_v48 = vld [vmem:[%s1528_s5 + $0x70] sm:$0xff]  ;;  %v597_v49 = vld [vmem:[%s1528_s5 + $0x78] sm:$0xff]  ;;  %v461_v59 = vld [vmem:[%s1526_s3 + $0x20] sm:$0xff] }
  0x16   : > { %1067 = vmatprep.subr.bf16.mxu0 %v1066_v18  ;;  %1025 = vmatpush3.bf16.msra.mxu1 %v1022_v13  ;;  %v1086_v50 = vpack.c.bf16 %v597_v49, %v596_v48  ;;  %v459_v54 = vld [vmem:[%s1526_s3 + $0x10] sm:$0xff]  ;;  %v460_v55 = vld [vmem:[%s1526_s3 + $0x18] sm:$0xff]  ;;  %v462_v60 = vld [vmem:[%s1526_s3 + $0x28] sm:$0xff]  ;;  %s1220_s13 = smov [#allocation2]  }
  0x17   : > { %s884_s16 = sshll.u32 %s326_s29, 4  ;;  %1027 = vmatprep.subr.bf16.mxu1 %v1026_v27  ;;  %s1213_s29 = smov 96   ;;  %v1038_v57 = vpack.c.bf16 %v460_v55, %v459_v54  ;;  %v1042_v0 = vpack.c.bf16 %v462_v60, %v461_v59  ;;  %v463_v3 = vld [vmem:[%s1526_s3 + $0x30] sm:$0xff]  ;;  %v464_v4 = vld [vmem:[%s1526_s3 + $0x38] sm:$0xff]  ;;  %v465_v9 = vld [vmem:[%s1526_s3 + $0x40] sm:$0xff] }
  0x18   : > { %s329_s22 = scalar_lea.vmem %s1523_s0, %s884_s16  ;;  %v1046_v8 = vpack.c.bf16 %v464_v4, %v463_v3  ;;  %v466_v10 = vld [vmem:[%s1526_s3 + $0x48] sm:$0xff]  ;;  %v467_v12 = vld [vmem:[%s1526_s3 + $0x50] sm:$0xff]  ;;  %v468_v13 = vld [vmem:[%s1526_s3 + $0x58] sm:$0xff] }
  0x19   : > { %v1360_v16 = vld [vmem:[%s329_s22] sm:$0xff]  ;;  %v1362_v17 = vld [vmem:[%s329_s22 + $0x8] sm:$0xf]  ;;  %1069 = vmatpush3.bf16.msra.mxu0 %v1066_v18  ;;  %v1050_v11 = vpack.c.bf16 %v466_v10, %v465_v9  ;;  %v1054_v14 = vpack.c.bf16 %v468_v13, %v467_v12  ;;  %vm1092_vm11 = vmpackc.low %vm722_vm9, %vm1215_vm10  ;;  %s324_s22 = scalar_lea.vmem [#allocation2], %s323_s14 }
  0x1a   : > { %v344_v19 = vrot.slane %v1360_v16, 1  ;;  %v345_v20 = vrot.slane %v1362_v17, 1  ;;  %v471_v21 = vrot.slane %v1360_v16, 2  ;;  %v472_v22 = vrot.slane %v1362_v17, 2  ;;  %1071 = vmatprep.subr.bf16.mxu0 %v1070_v33  ;;  %1029 = vmatpush3.bf16.msra.mxu1 %v1026_v27  ;;  %v872_v15 = vld [vmem:[%s1525_s2] ss:$0 sm:$0xff] }
  0x1b   : > { %v600_v23 = vrot.slane %v1360_v16, 3  ;;  %v601_v24 = vrot.slane %v1362_v17, 3  ;;  %1031 = vmatprep.subr.bf16.mxu1 %v1030_v36  ;;  %v715_v35 = vld [vmem:[%s1530_s7] sm:$0xff]  ;;  %s811_s25 = sshll.u32 %s324_s22, 4  ;;  %s1483_s25 = int_to_ptr.vmem [resolvable:$true] %s811_s25 }
  0x1c   : > { %v346_v28 = vsel %vm343_vm0, %v344_v19, %v345_v20  ;;  %v473_v29 = vsel %vm470_vm1, %v471_v21, %v472_v22  ;;  %v875_v42 = vld [vmem:[%s1527_s4] ss:$0 sm:$0xff]  ;;  %vm796_vm0 = vcmask 16384  }
  0x1d   : > { %347 = vrot.lane.b32.xlu0 %v346_v28, %s1211_s23  ;;  %474 = vrot.lane.b32.xlu1 %v473_v29, %s1212_s24  ;;  %v602_v32 = vsel %vm599_vm2, %v600_v23, %v601_v24  ;;  %v878_v23 = vld [vmem:[%s1529_s6] ss:$0 sm:$0xff] }
  0x1e   : > { %v1142_v39 = vpack.i.bf16 %v601_v24, %v602_v32  ;;  %1073 = vmatpush3.bf16.msra.mxu0 %v1070_v33  ;;  %1033 = vmatpush3.bf16.msra.mxu1 %v1030_v36  ;;  %v716_v36 = vld [vmem:[%s1530_s7 + $0x8] sm:$0xf] }
  0x1f   : > { %1075 = vmatprep.subr.bf16.mxu0 %v1074_v40  ;;  %1035 = vmatprep.subr.bf16.mxu1 %v1034_v43  ;;  %v1091_v38 = vpack.c.bf16 %v716_v36, %v715_v35 }
  0x21   : > { %349 = vrot.lane.b32.xlu0 %v345_v20, %s1211_s23  ;;  %476 = vrot.lane.b32.xlu1 %v472_v22, %s1212_s24  ;;  %s1481_s23 = scalar_lea.hbm %s1532_s9, %s881_s21  ;;  %s799_s24 = scalar_lea.sflag [#allocation3], %s323_s14 }
  0x22   : > { %1077 = vmatpush3.bf16.msra.mxu0 %v1074_v40 }
  0x23   : > { %1079 = vmatprep.subr.bf16.mxu0 %v1078_v44 }
  0x25   : > { %1143 = vrot.lane.b32.xlu0 %v1142_v39, %s1213_s29 }
  0x26   : > { %1081 = vmatpush3.bf16.msra.mxu0 %v1078_v44 }
  0x27   : > { %1083 = vmatprep.subr.bf16.mxu0 %v1082_v47 }
  0x2a   : > { %1085 = vmatpush3.bf16.msra.mxu0 %v1082_v47 }
  0x2b   : > { %1087 = vmatprep.subr.bf16.mxu0 %v1086_v50 }
  0x2e   : > { %1089 = vmatpush3.bf16.msra.mxu0 %v1086_v50 }
  0x2f   : > { %1090 = vmatprep.subr.bf16.mxu0 %v1214_v37 }
  0x8f   : > { %v348_v51 = vpop.permute.xlu0 %347  ;;  %v475_v52 = vpop.permute.xlu1 %474 }
  0x90   : > { %v354_v53 = vsel %vm353_vm3, %v1360_v16, %v348_v51 }
  0x91   : > { %946 = vmatprep.mubr.msk.f32.mxu1 %vm362_vm4, %v354_v53  ;;  %v480_v61 = vsel %vm362_vm4, %v354_v53, %v475_v52 }
  0x93   : > { %v350_v56 = vpop.permute.xlu0 %349  ;;  %v477_v62 = vpop.permute.xlu1 %476 }
  0x94   : > { %v355_v58 = vsel %vm353_vm3, %v1362_v17, %v350_v56  ;;  %v1218_v56 = vmov 0.0  }
  0x95   : > { %947 = vmatmul.mubr.msk.f32.vlgmr.msra.gmra.mrb[0].mxu1 %vm362_vm4, %v355_v58  ;;  %v481_v5 = vsel %vm362_vm4, %v355_v58, %v477_v62 }
  0x96   : > { %1037 = vmatpush3.bf16.msra.mxu1 %v1034_v43  ;;  %973 = vmatprep.mubr.msk.f32.mxu1 %vm488_vm5, %v480_v61 }
  0x97   : > { %v1144_v63 = vpop.permute.xlu0 %1143  ;;  %1039 = vmatprep.subr.bf16.mxu1 %v1038_v57 }
  0x98   : > { %v1146_v1 = vunpack.i.h.bf16 %v1144_v63  ;;  %v1145_v2 = vunpack.i.l.bf16 %v1144_v63 }
  0x9a   : > { %1041 = vmatpush3.bf16.msra.mxu1 %v1038_v57  ;;  %v609_v6 = vsel %vm488_vm5, %v480_v61, %v1145_v2  ;;  %v610_v7 = vsel %vm488_vm5, %v481_v5, %v1146_v1 }
  0x9b   : > { %1008 = vmatprep.mubr.f32.mxu0 %v609_v6  ;;  %1043 = vmatprep.subr.bf16.mxu1 %v1042_v0 }
  0x9c   : > { %1009 = vmatmul.mubr.f32.vlgmr.msra.gmra.mrb[0].mxu0 %v610_v7 }
  0x9d   : > { %1093 = vmatpush3.bf16.msk.msra.mxu0 %vm1092_vm11, %v1091_v38  ;;  %1015 = vmatprep.mubr.msk.f32.mxu0 %vm1217_vm13, %v1218_v56 }
  0x9e   : > { %1045 = vmatpush3.bf16.msra.mxu1 %v1042_v0 }
  0x9f   : > { %1047 = vmatprep.subr.bf16.mxu1 %v1046_v8 }
  0xa2   : > { %1049 = vmatpush3.bf16.msra.mxu1 %v1046_v8  ;;  %v717_v8 = vld [vmem:[%s1531_s8] sm:$0x1] }
  0xa3   : > { %1051 = vmatprep.subr.bf16.mxu1 %v1050_v11 }
  0xa6   : > { %1053 = vmatpush3.bf16.msra.mxu1 %v1050_v11 }
  0xa7   : > { %1055 = vmatprep.subr.bf16.mxu1 %v1054_v14 }
  0xaa   : > { %1057 = vmatpush3.bf16.msra.mxu1 %v1054_v14 }
  0xad   : > { %974 = vmatmul.mubr.msk.f32.vlgmr.msra.gmra.mrb[2].mxu1 %vm488_vm5, %v481_v5 }
 0x168   : > { %v948_v16 = vpop.f32.mrb[0].mxu1 }
 0x169   : > { %v441_v17 = vadd.f32 %v948_v16, %v872_v15  ;;  %v435_v18 = vpop.f32.mrb[1].mxu1 }
 0x16a   : > { %v436_v19 = vadd.f32 %v872_v15, %v435_v18 }
 0x16b   : > { %v445_v20 = vmax.f32 %v441_v17, 0.0 }
 0x16c   : > { %v444_v21 = vmax.f32 %v436_v19, 0.0 }
 0x16d   : > { %v449_v22 = vsel %vm448_vm6, %v445_v20, -inf }
 0x16e   : > { %v447_v24 = vsel %vm446_vm7, %v444_v21, -inf }
 0x16f   : > { %v450_v25 = vmax.f32 %v447_v24, %v449_v22  ;;  %v1010_v26 = vpop.f32.mrb[0].mxu0 }
 0x170   : > { %v689_v27 = vadd.f32 %v1010_v26, %v878_v23  ;;  %v683_v28 = vpop.f32.mrb[1].mxu0 }
 0x171   : > { %v684_v29 = vadd.f32 %v878_v23, %v683_v28  ;;  %v451_v62 = vrot.slane %v450_v25, 4 }
 0x172   : > { %v693_v30 = vmax.f32 %v689_v27, 0.0 }
 0x173   : > { %v692_v31 = vmax.f32 %v684_v29, 0.0  ;;  %v452_v63 = vmax.f32 %v450_v25, %v451_v62 }
 0x174   : > { %v696_v32 = vsel %vm695_vm8, %v693_v30, -inf }
 0x175   : > { %v694_v33 = vsel %vm446_vm7, %v692_v31, -inf  ;;  %v453_v0 = vrot.slane %v452_v63, 2 }
 0x176   : > { %v697_v34 = vmax.f32 %v694_v33, %v696_v32 }
 0x177   : > { %v454_v1 = vmax.f32 %v452_v63, %v453_v0 }
 0x178   : > { %v698_v39 = vrot.slane %v697_v34, 4 }
 0x179   : > { %v455_v2 = vrot.slane %v454_v1, 1 }
 0x17a   : > { %v699_v40 = vmax.f32 %v697_v34, %v698_v39 }
 0x17b   : > { %v456_v3 = vmax.f32 %v454_v1, %v455_v2 }
 0x17c   : > { %v700_v41 = vrot.slane %v699_v40, 2 }
 0x17e   : > { %v701_v43 = vmax.f32 %v699_v40, %v700_v41 }
 0x180   : > { %v975_v44 = vpop.f32.mrb[2].mxu1  ;;  %v702_v45 = vrot.slane %v701_v43, 1 }
 0x181   : > { %v567_v46 = vadd.f32 %v975_v44, %v875_v42  ;;  %v561_v47 = vpop.f32.mrb[3].mxu1 }
 0x182   : > { %v562_v48 = vadd.f32 %v875_v42, %v561_v47  ;;  %v703_v49 = vmax.f32 %v701_v43, %v702_v45 }
 0x183   : > { %v571_v50 = vmax.f32 %v567_v46, 0.0 }
 0x184   : > { %v570_v51 = vmax.f32 %v562_v48, 0.0  ;;  %709 = vrot.lane.b32.xlu0 %v703_v49, %s1216_s27  ;;  %s1147_s27 = scalar_lea.vmem %s1483_s25, 16 }
 0x185   : > { %v574_v52 = vsel %vm573_vm12, %v571_v50, -inf  ;;  %p1148_p11 = scmp.ne.s32.totalorder %s1483_s25, %s1147_s27 }
 0x186   : > { %v572_v53 = vsel %vm446_vm7, %v570_v51, -inf }
 0x187   : > { %v575_v54 = vmax.f32 %v572_v53, %v574_v52  ;;  %p1149_p12 = pnand %p1148_p11, %p1309_p5 }
 0x189   : > { %v576_v55 = vrot.slane %v575_v54, 4  ;;  %p1150_p13 = pneg %p1149_p12 }
 0x18b   : > { %v577_v57 = vmax.f32 %v575_v54, %v576_v55 }
 0x18d   : > { %v578_v58 = vrot.slane %v577_v57, 2 }
 0x18f   : > { %v579_v59 = vmax.f32 %v577_v57, %v578_v58 }
 0x191   : > { %v580_v60 = vrot.slane %v579_v59, 1 }
 0x193   : > { %v581_v61 = vmax.f32 %v579_v59, %v580_v60 }
 0x195   : > { %705 = vrot.lane.b32.xlu1 %v581_v61, %s1219_s28  ;;  %s1151_s28 = sshll.u32 %s1220_s13, 4  ;;  %s1152_s28 = int_to_ptr.vmem [resolvable:$false] %s1151_s28 }
 0x196   : > { %s1153_s16 = scalar_lea.vmem %s1152_s28, 32  ;;  %p1154_p0 = scmp.lt.s32.totalorder %s1483_s25, %s1152_s28 }
 0x197   : > { %p1155_p1 = scmp.lt.s32.totalorder %s1153_s16, %s1147_s27 }
 0x199   : > { %p1156_p2 = por %p1155_p1, %p1154_p0 }
 0x19b   : > { %p1157_p3 = pnand %p1156_p2, %p1150_p13 }
 0x1f6   : > { %v710_v5 = vpop.permute.xlu0 %709 }
 0x207   : > { %v706_v4 = vpop.permute.xlu1 %705 }
 0x208   : > { %v712_v6 = vsel %vm446_vm7, %v456_v3, %v706_v4 }
 0x209   : > { %v714_v7 = vsel %vm713_vm14, %v712_v6, %v710_v5 }
 0x20a   : > { %1016 = vmatmul.mubr.msk.f32.vlgmr.msra.gmra.mrb[2].mxu0 %vm718_vm15, %v714_v7 }
 0x2dd   : > { %v792_v9 = vpop.f32.mrb[2].mxu0 }
 0x2de   : > { %v793_v10 = vadd.f32 %v792_v9, %v717_v8  ;;  %v1017_v11 = vpop.f32.mrb[3].mxu0 }
 0x2e0   : > { %797 = vst.msk [vmem:[%s324_s22] sm:$0x1] %vm796_vm0, %v793_v10 }
 0x2e1   : > { %1160 = shalt.err (!%p1157_p3)
}
 0x2e2   : > { %s1161_s14 = scalar_lea.hbm %s1481_s23, 16  ;;  %s1165_s22 = scalar_lea.hbm %s1532_s9, 32 }
 0x2e3   : > { %p1162_p4 = scmp.ne.s32.totalorder %s1481_s23, %s1161_s14  ;;  %p1166_p9 = scmp.lt.u32.totalorder %s1481_s23, %s1532_s9 }
 0x2e4   : > { %p1167_p10 = scmp.lt.u32.totalorder %s1165_s22, %s1161_s14  ;;  %p1169_p12 = scmp.lt.u32.totalorder %s1161_s14, %s1481_s23 }
 0x2e5   : > { %p1163_p7 = pnand %p1162_p4, %p1309_p5 }
 0x2e6   : > { %p1168_p11 = por %p1167_p10, %p1166_p9 }
 0x2e7   : > { %p1164_p8 = pneg %p1163_p7 }
 0x2e8   : > { %p1170_p13 = por %p1169_p12, %p1168_p11 }
 0x2ea   : > { %p1171_p0 = pnand %p1170_p13, %p1164_p8 }
 0x2ec   : > { %1174 = shalt.err (!%p1171_p0)
}
 0x2ed   : > { %1094 = dma.vmem_to_hbm [thread:$0]  (%p1309_p5), %s1483_s25, 16, %s1481_s23, %s799_s24  }
 0x2ee PF: > { %p1100_p1 = scmp.ge.s32.totalorder %s1209_s12, 2  ;;  %s823_s27 = sand.u32 1, %s1197_s30  }
 0x2ef   : > { %s824_s13 = scalar_lea.sflag [#allocation3], %s823_s27 }
 0x2f0   : > { %p1097_p2 = pnand %p1100_p1, %p1313_p6 }
 0x2f2   : > { %1192 = dma.done.wait (!%p1097_p2), %s824_s13, 16  }
 0x2f3   : > { %1194 = vsyncadd (!%p1097_p2), %s824_s13, 4294967280  ;;  %p19_p3 = scmp.ge.s32.totalorder %s1296_s15, 4   ;;  %s1535_s30 = smov %s1201_s10 }
 0x2f4   : > { %s1536_s10 = smov %s1205_s11  ;;  %s1537_s11 = smov %s1307_s18 }
 0x2f5   : > { %s1538_s12 = smov %s1296_s15  ;;  %21 = sbr.rel (!%p19_p3) target bundleno = 3 (0x3), region = 91 }
 0x2fc   :  { %828 = vsyncpa [#allocation3], 1 }
 0x2fd   :  { %830 = vsyncpa [#allocation3 + $0x1], 1 }

</bundles_post_ra>
